<compile_context>
chip_gen: v7x
topology: tpu7x:2x2x1
jax: 0.10.0
libtpu: 0.0.40
codegen_flags: <defaults>
</compile_context>

<pallas_src>
import functools

import jax
import jax.numpy as jnp
from jax.experimental import pallas as pl
from jax.experimental.pallas import tpu as pltpu

_EPS = 1e-8                       # torch cosine_similarity default eps
_LANE = 128
_TARGET_TILE_BYTES = 6 * 1024 * 1024   # per input tile (good on v6e/v7x, fine on v5e)
_VMEM_LIMIT_BYTES = 48 << 20           # 2 inputs x 2 bufs x 6 MiB = 24 MiB + headroom


def _round_up(x, m):
    return (x + m - 1) // m * m


def _sublane_multiple(dtype):
    itemsize = jnp.dtype(dtype).itemsize
    return max(8, 32 // max(1, itemsize))   # 8 for f32, 16 for bf16, 32 for int8/fp8


def _choose_tiling(batch, dim, dtype):
    """Returns (block_rows, block_cols) sized from the padded-VMEM byte budget."""
    itemsize = jnp.dtype(dtype).itemsize
    sub = _sublane_multiple(dtype)
    padded_dim = _round_up(dim, _LANE)

    # Very wide embeddings: even `sub` rows of the full lane-padded feature dim
    # exceed the tile budget -> chunk the feature axis (reduction grid axis).
    if sub * padded_dim * itemsize > _TARGET_TILE_BYTES:
        block_cols = max(
            _LANE, (_TARGET_TILE_BYTES // (sub * itemsize)) // _LANE * _LANE)
        return sub, block_cols

    block_cols = dim                 # full feature extent (always layout-legal)

    rows = _TARGET_TILE_BYTES // (padded_dim * itemsize)
    rows = max(sub, (rows // sub) * sub)

    if rows >= batch:
        # Whole batch fits one tile.  Split into >=2 tiles when sublane-legal so
        # both v7x TensorCores get work and the input DMAs still pipeline.
        if batch >= 2 * sub:
            rows = _round_up(pl.cdiv(batch, 2), sub)
        else:
            rows = batch             # full-extent block along batch (layout-legal)
    return rows, block_cols


def _cosine_loss_kernel(x_ref, y_ref, o_ref, dot_acc, sxx_acc, syy_acc, *,
                        batch_size, feat_dim, block_rows, block_cols):
    i = pl.program_id(0)             # batch-tile index (parallel)
    j = pl.program_id(1)             # feature-chunk index (arbitrary / reduction)

    @pl.when(j == 0)
    def _():
        dot_acc[...] = jnp.zeros_like(dot_acc)
        sxx_acc[...] = jnp.zeros_like(sxx_acc)
        syy_acc[...] = jnp.zeros_like(syy_acc)

    x = x_ref[...].astype(jnp.float32)
    y = y_ref[...].astype(jnp.float32)

    if feat_dim % block_cols != 0:
        # Trailing feature chunk carries padding columns: zero them with a lane
        # select (never a multiply), so junk Inf/NaN cannot reach the accumulators.
        col_ids = j * block_cols + jax.lax.broadcasted_iota(jnp.int32, x.shape, 1)
        col_ok = col_ids < feat_dim
        zero = jnp.float32(0.0)
        x = jnp.where(col_ok, x, zero)
        y = jnp.where(col_ok, y, zero)

    dot_acc[...] += jnp.sum(x * y, axis=-1, keepdims=True)
    sxx_acc[...] += jnp.sum(x * x, axis=-1, keepdims=True)
    syy_acc[...] += jnp.sum(y * y, axis=-1, keepdims=True)

    @pl.when(j == pl.num_programs(1) - 1)
    def _():
        eps2 = jnp.float32(_EPS * _EPS)
        # torch semantics: dot / (max(||x||, eps) * max(||y||, eps)).
        # Two separate EUP rsqrts; never form sxx*syy (f32 overflow risk).
        inv = (jax.lax.rsqrt(jnp.maximum(sxx_acc[...], eps2)) *
               jax.lax.rsqrt(jnp.maximum(syy_acc[...], eps2)))
        sim = dot_acc[...] * inv                                   # (TB, 1)

        # Mask rows of the trailing (possibly partial) batch tile (select, not mul).
        row_ids = i * block_rows + jax.lax.broadcasted_iota(
            jnp.int32, sim.shape, 0)
        per_row = jnp.where(row_ids < batch_size, 1.0 - sim, jnp.float32(0.0))

        # Per-tile partial (un-normalized) sum -> scalar SMEM output.
        o_ref[0, 0] = jnp.sum(per_row)


def cosine_similarity_loss(embeddings1, embeddings2):
    """mean(1 - cosine_similarity(e1, e2, dim=1)) — matches the PyTorch module."""
    assert embeddings1.shape == embeddings2.shape
    assert embeddings1.ndim == 2
    B, D = embeddings1.shape

    tb, tc = _choose_tiling(B, D, embeddings1.dtype)
    num_row_tiles = pl.cdiv(B, tb)
    num_col_tiles = pl.cdiv(D, tc)

    kernel = functools.partial(
        _cosine_loss_kernel,
        batch_size=B, feat_dim=D, block_rows=tb, block_cols=tc)

    partials = pl.pallas_call(
        kernel,
        out_shape=jax.ShapeDtypeStruct((num_row_tiles, 1), jnp.float32),
        grid_spec=pltpu.PrefetchScalarGridSpec(
            num_scalar_prefetch=0,
            grid=(num_row_tiles, num_col_tiles),
            in_specs=[
                pl.BlockSpec((tb, tc), lambda i, j: (i, j)),
                pl.BlockSpec((tb, tc), lambda i, j: (i, j)),
            ],
            out_specs=pl.BlockSpec((1, 1), lambda i, j: (i, 0),
                                   memory_space=pltpu.MemorySpace.SMEM),
            scratch_shapes=[pltpu.VMEM((tb, 1), jnp.float32)] * 3,
        ),
        compiler_params=pltpu.CompilerParams(
            dimension_semantics=("parallel", "arbitrary"),
            vmem_limit_bytes=_VMEM_LIMIT_BYTES,
        ),
    )(embeddings1, embeddings2)

    # Tiny epilogue: sum per-tile partials, normalize by the true batch size.
    return jnp.sum(partials) / jnp.float32(B)


def _reference(e1, e2):
    e1 = e1.astype(jnp.float32)
    e2 = e2.astype(jnp.float32)
    dot = jnp.sum(e1 * e2, axis=1)
    n1 = jnp.maximum(jnp.linalg.norm(e1, axis=1), _EPS)
    n2 = jnp.maximum(jnp.linalg.norm(e2, axis=1), _EPS)
    return jnp.mean(1.0 - dot / (n1 * n2))


if __name__ == "__main__":
    key = jax.random.PRNGKey(0)
    k1, k2, k3, k4 = jax.random.split(key, 4)

    # Small embedding batch consistent with the module's forward.
    B, D = 8, 32
    e1 = jax.random.normal(k1, (B, D), dtype=jnp.float32)
    e2 = jax.random.normal(k2, (B, D), dtype=jnp.float32)
    loss = cosine_similarity_loss(e1, e2)
    jax.block_until_ready(loss)
    ref = _reference(e1, e2)
    assert jnp.allclose(loss, ref, atol=1e-5, rtol=1e-4), (loss, ref)

    # Second shape exercising a partial trailing batch tile / multi-tile grid.
    B2, D2 = 20, 160
    f1 = jax.random.normal(k3, (B2, D2), dtype=jnp.float32)
    f2 = jax.random.normal(k4, (B2, D2), dtype=jnp.float32)
    loss2 = cosine_similarity_loss(f1, f2)
    jax.block_until_ready(loss2)
    ref2 = _reference(f1, f2)
    assert jnp.allclose(loss2, ref2, atol=1e-5, rtol=1e-4), (loss2, ref2)

    print("KERNEL_OK")
</pallas_src>

<mosaic_0001>
module attributes {stable_mosaic.version = 11 : i64} {
  func.func @_cosine_loss_kernel(%arg0: i32, %arg1: i32, %arg2: memref<8x32xf32, #tpu.memory_space<vmem>>, %arg3: memref<8x32xf32, #tpu.memory_space<vmem>>, %arg4: memref<1x1xf32, #tpu.memory_space<smem>>, %arg5: memref<8x1xf32, #tpu.memory_space<vmem>>, %arg6: memref<8x1xf32, #tpu.memory_space<vmem>>, %arg7: memref<8x1xf32, #tpu.memory_space<vmem>>) attributes {dimension_semantics = [#tpu.dimension_semantics<parallel>, #tpu.dimension_semantics<arbitrary>], iteration_bounds = array<i64: 1, 1>, scalar_prefetch = 0 : i64, scratch_operands = 3 : i64, tpu.core_type = #tpu.core_type<tc>, window_params = [{transform_indices = @transform_0, window_bounds = array<i64: 8, 32>}, {transform_indices = @transform_1, window_bounds = array<i64: 8, 32>}, {transform_indices = @transform_2, window_bounds = array<i64: 1, 1>}]} {
    %c0_i32 = arith.constant 0 : i32
    %0 = arith.cmpi eq, %arg1, %c0_i32 : i32
    %1 = arith.extui %0 : i1 to i32
    %c0_i32_0 = arith.constant 0 : i32
    %2 = arith.cmpi ne, %1, %c0_i32_0 : i32
    scf.if %2 {
      %cst_20 = arith.constant 0.000000e+00 : f32
      %26 = vector.broadcast %cst_20 : f32 to vector<8x1xf32>
      %c0_21 = arith.constant 0 : index
      %c0_22 = arith.constant 0 : index
      %27 = vector.load %arg5[%c0_21, %c0_22] : memref<8x1xf32, #tpu.memory_space<vmem>>, vector<8x1xf32>
      tpu.vector_store %arg5[%c0_21, %c0_22], %26 {strides = array<i32>} : memref<8x1xf32, #tpu.memory_space<vmem>>, vector<8x1xf32>,
      %cst_23 = arith.constant 0.000000e+00 : f32
      %28 = vector.broadcast %cst_23 : f32 to vector<8x1xf32>
      %c0_24 = arith.constant 0 : index
      %c0_25 = arith.constant 0 : index
      %29 = vector.load %arg6[%c0_24, %c0_25] : memref<8x1xf32, #tpu.memory_space<vmem>>, vector<8x1xf32>
      tpu.vector_store %arg6[%c0_24, %c0_25], %28 {strides = array<i32>} : memref<8x1xf32, #tpu.memory_space<vmem>>, vector<8x1xf32>,
      %cst_26 = arith.constant 0.000000e+00 : f32
      %30 = vector.broadcast %cst_26 : f32 to vector<8x1xf32>
      %c0_27 = arith.constant 0 : index
      %c0_28 = arith.constant 0 : index
      %31 = vector.load %arg7[%c0_27, %c0_28] : memref<8x1xf32, #tpu.memory_space<vmem>>, vector<8x1xf32>
      tpu.vector_store %arg7[%c0_27, %c0_28], %30 {strides = array<i32>} : memref<8x1xf32, #tpu.memory_space<vmem>>, vector<8x1xf32>,
    } else {
    }
    %c0 = arith.constant 0 : index
    %c0_1 = arith.constant 0 : index
    %3 = vector.load %arg2[%c0, %c0_1] : memref<8x32xf32, #tpu.memory_space<vmem>>, vector<8x32xf32>
    %c0_2 = arith.constant 0 : index
    %c0_3 = arith.constant 0 : index
    %4 = vector.load %arg3[%c0_2, %c0_3] : memref<8x32xf32, #tpu.memory_space<vmem>>, vector<8x32xf32>
    %c0_4 = arith.constant 0 : index
    %c0_5 = arith.constant 0 : index
    %5 = vector.load %arg5[%c0_4, %c0_5] : memref<8x1xf32, #tpu.memory_space<vmem>>, vector<8x1xf32>
    %6 = arith.mulf %3, %4 : vector<8x32xf32>
    %cst = arith.constant dense<0.000000e+00> : vector<8xf32>
    %7 = vector.multi_reduction <add>, %6, %cst [1] : vector<8x32xf32> to vector<8xf32>
    %8 = vector.shape_cast %7 : vector<8xf32> to vector<8x1xf32>
    %9 = arith.addf %5, %8 : vector<8x1xf32>
    %c0_6 = arith.constant 0 : index
    %c0_7 = arith.constant 0 : index
    %10 = vector.load %arg5[%c0_6, %c0_7] : memref<8x1xf32, #tpu.memory_space<vmem>>, vector<8x1xf32>
    tpu.vector_store %arg5[%c0_6, %c0_7], %9 {strides = array<i32>} : memref<8x1xf32, #tpu.memory_space<vmem>>, vector<8x1xf32>,
    %c0_8 = arith.constant 0 : index
    %c0_9 = arith.constant 0 : index
    %11 = vector.load %arg6[%c0_8, %c0_9] : memref<8x1xf32, #tpu.memory_space<vmem>>, vector<8x1xf32>
    %12 = arith.mulf %3, %3 : vector<8x32xf32>
    %cst_10 = arith.constant dense<0.000000e+00> : vector<8xf32>
    %13 = vector.multi_reduction <add>, %12, %cst_10 [1] : vector<8x32xf32> to vector<8xf32>
    %14 = vector.shape_cast %13 : vector<8xf32> to vector<8x1xf32>
    %15 = arith.addf %11, %14 : vector<8x1xf32>
    %c0_11 = arith.constant 0 : index
    %c0_12 = arith.constant 0 : index
    %16 = vector.load %arg6[%c0_11, %c0_12] : memref<8x1xf32, #tpu.memory_space<vmem>>, vector<8x1xf32>
    tpu.vector_store %arg6[%c0_11, %c0_12], %15 {strides = array<i32>} : memref<8x1xf32, #tpu.memory_space<vmem>>, vector<8x1xf32>,
    %c0_13 = arith.constant 0 : index
    %c0_14 = arith.constant 0 : index
    %17 = vector.load %arg7[%c0_13, %c0_14] : memref<8x1xf32, #tpu.memory_space<vmem>>, vector<8x1xf32>
    %18 = arith.mulf %4, %4 : vector<8x32xf32>
    %cst_15 = arith.constant dense<0.000000e+00> : vector<8xf32>
    %19 = vector.multi_reduction <add>, %18, %cst_15 [1] : vector<8x32xf32> to vector<8xf32>
    %20 = vector.shape_cast %19 : vector<8xf32> to vector<8x1xf32>
    %21 = arith.addf %17, %20 : vector<8x1xf32>
    %c0_16 = arith.constant 0 : index
    %c0_17 = arith.constant 0 : index
    %22 = vector.load %arg7[%c0_16, %c0_17] : memref<8x1xf32, #tpu.memory_space<vmem>>, vector<8x1xf32>
    tpu.vector_store %arg7[%c0_16, %c0_17], %21 {strides = array<i32>} : memref<8x1xf32, #tpu.memory_space<vmem>>, vector<8x1xf32>,
    %c0_i32_18 = arith.constant 0 : i32
    %23 = arith.cmpi eq, %arg1, %c0_i32_18 : i32
    %24 = arith.extui %23 : i1 to i32
    %c0_i32_19 = arith.constant 0 : i32
    %25 = arith.cmpi ne, %24, %c0_i32_19 : i32
    scf.if %25 {
      %c0_20 = arith.constant 0 : index
      %c0_21 = arith.constant 0 : index
      %26 = vector.load %arg6[%c0_20, %c0_21] : memref<8x1xf32, #tpu.memory_space<vmem>>, vector<8x1xf32>
      %cst_22 = arith.constant 1.000000e-16 : f32
      %27 = vector.broadcast %cst_22 : f32 to vector<8x1xf32>
      %28 = arith.maximumf %26, %27 : vector<8x1xf32>
      %29 = math.rsqrt %28 : vector<8x1xf32>
      %c0_23 = arith.constant 0 : index
      %c0_24 = arith.constant 0 : index
      %30 = vector.load %arg7[%c0_23, %c0_24] : memref<8x1xf32, #tpu.memory_space<vmem>>, vector<8x1xf32>
      %cst_25 = arith.constant 1.000000e-16 : f32
      %31 = vector.broadcast %cst_25 : f32 to vector<8x1xf32>
      %32 = arith.maximumf %30, %31 : vector<8x1xf32>
      %33 = math.rsqrt %32 : vector<8x1xf32>
      %34 = arith.mulf %29, %33 : vector<8x1xf32>
      %c0_26 = arith.constant 0 : index
      %c0_27 = arith.constant 0 : index
      %35 = vector.load %arg5[%c0_26, %c0_27] : memref<8x1xf32, #tpu.memory_space<vmem>>, vector<8x1xf32>
      %36 = arith.mulf %35, %34 : vector<8x1xf32>
      %c8_i32 = arith.constant 8 : i32
      %37 = arith.muli %arg0, %c8_i32 : i32
      %38 = tpu.iota {dimensions = array<i32: 0>} : vector<8x1xi32>
      %39 = vector.broadcast %37 : i32 to vector<8x1xi32>
      %40 = arith.addi %39, %38 : vector<8x1xi32>
      %c8_i32_28 = arith.constant 8 : i32
      %41 = vector.broadcast %c8_i32_28 : i32 to vector<8x1xi32>
      %42 = arith.cmpi slt, %40, %41 : vector<8x1xi32>
      %cst_29 = arith.constant 1.000000e+00 : f32
      %43 = vector.broadcast %cst_29 : f32 to vector<8x1xf32>
      %44 = arith.subf %43, %36 : vector<8x1xf32>
      %cst_30 = arith.constant 0.000000e+00 : f32
      %45 = vector.broadcast %cst_30 : f32 to vector<8x1xf32>
      %46 = arith.select %42, %44, %45 : vector<8x1xi1>, vector<8x1xf32>
      %47 = vector.shape_cast %46 : vector<8x1xf32> to vector<1x8x1xf32>
      %cst_31 = arith.constant dense<0.000000e+00> : vector<1xf32>
      %48 = vector.multi_reduction <add>, %47, %cst_31 [1, 2] : vector<1x8x1xf32> to vector<1xf32>
      %49 = vector.shape_cast %48 : vector<1xf32> to vector<1x1x1xf32>
      %50 = vector.extract %49[0, 0, 0] : f32 from vector<1x1x1xf32>
      %c0_32 = arith.constant 0 : index
      %c0_33 = arith.constant 0 : index
      %51 = memref.load %arg4[%c0_32, %c0_33] : memref<1x1xf32, #tpu.memory_space<smem>>
      memref.store %50, %arg4[%c0_32, %c0_33] : memref<1x1xf32, #tpu.memory_space<smem>>
    } else {
    }
    return
  }
  func.func @transform_0(%arg0: i32, %arg1: i32) -> (i32, i32) {
    %c0_i32 = arith.constant 0 : i32
    return %arg0, %arg1 : i32, i32
  }
  func.func @transform_1(%arg0: i32, %arg1: i32) -> (i32, i32) {
    %c0_i32 = arith.constant 0 : i32
    return %arg0, %arg1 : i32, i32
  }
  func.func @transform_2(%arg0: i32, %arg1: i32) -> (i32, i32) {
    %c0_i32 = arith.constant 0 : i32
    %c0_i32_0 = arith.constant 0 : i32
    return %arg0, %c0_i32 : i32, i32
  }
}

</mosaic_0001>

<bundles_post_ra>
// kernel: tpu_custom_call.1
= control target key start
LH: loop header
LB: loop body
LE: loop exit
PB: predicated region body
PF: predicated region fallthrough
CT: control target
= control target key end

     0   :  { %7 = vsyncpa [#allocation6], 0  ;;  %s248_s0 = inlined_call_operand.hbm [shape: f32[8,32], index: 0, kind: input, shape index: {}]   ;;  %s249_s1 = inlined_call_operand.hbm [shape: f32[8,32], index: 1, kind: input, shape index: {}]   ;;  %s250_s2 = inlined_call_operand.hbm [shape: f32[1,1], index: 2, kind: output, shape index: {}]  }
   0x1   :  { %8 = vsyncpa [#allocation9], 0 }
   0x2   :  { %9 = vsyncpa [#allocation7], 0  ;;  %s186_s9 = smov [#allocation5]   ;;  %s187_s11 = smov [#allocation8]  }
   0x3   :  { %s16_s10 = sshll.u32 %s186_s9, 4  ;;  %s26_s12 = sshll.u32 %s187_s11, 4  ;;  %s17_s10 = int_to_ptr.vmem [resolvable:$true] %s16_s10  ;;  %s27_s12 = int_to_ptr.vmem [resolvable:$true] %s26_s12 }
   0x4   :  { %s126_s15 = scalar_lea.hbm %s248_s0, 128 }
   0x5   :  { %p127_p0 = scmp.ne.s32.totalorder %s248_s0, %s126_s15  ;;  %p130_p1 = scmp.lt.u32.totalorder %s126_s15, %s248_s0 }
   0x7   :  { %p132_p2 = pnand %p130_p1, %p127_p0 }
   0x9   :  { %135 = shalt.err (!%p132_p2)
}
   0xa   :  { %s136_s20 = scalar_lea.vmem %s17_s10, 128  ;;  %p141_p4 = scmp.lt.s32.totalorder %s17_s10, %s17_s10 }
   0xb   :  { %p137_p3 = scmp.ne.s32.totalorder %s17_s10, %s136_s20  ;;  %p142_p5 = scmp.lt.s32.totalorder %s136_s20, %s136_s20 }
   0xd   :  { %p143_p6 = por %p142_p5, %p141_p4 }
   0xf   :  { %p144_p7 = pnand %p143_p6, %p137_p3 }
  0x11   :  { %147 = shalt.err (!%p144_p7)
}
  0x12   :  { %19 = dma.hbm_to_vmem [thread:$0]  %s248_s0, 128, %s17_s10, [#allocation6]  }
  0x13   :  { %s148_s25 = scalar_lea.hbm %s249_s1, 128 }
  0x14   :  { %p149_p8 = scmp.ne.s32.totalorder %s249_s1, %s148_s25  ;;  %p152_p9 = scmp.lt.u32.totalorder %s148_s25, %s249_s1 }
  0x16   :  { %p154_p10 = pnand %p152_p9, %p149_p8 }
  0x18   :  { %157 = shalt.err (!%p154_p10)
}
  0x19   :  { %s158_s30 = scalar_lea.vmem %s27_s12, 128  ;;  %p163_p12 = scmp.lt.s32.totalorder %s27_s12, %s27_s12 }
  0x1a   :  { %p159_p11 = scmp.ne.s32.totalorder %s27_s12, %s158_s30  ;;  %p164_p13 = scmp.lt.s32.totalorder %s158_s30, %s158_s30 }
  0x1c   :  { %p165_p0 = por %p164_p13, %p163_p12 }
  0x1e   :  { %p166_p1 = pnand %p165_p0, %p159_p11 }
  0x20   :  { %169 = shalt.err (!%p166_p1)
}
  0x21   :  { %29 = dma.hbm_to_vmem [thread:$0]  %s249_s1, 128, %s27_s12, [#allocation9]  }
  0x22   :  { %180 = dma.done.wait [#allocation6], 128  }
  0x23   :  { %181 = vsyncadd [#allocation6], 4294967168 }
  0x24   :  { %182 = dma.done.wait [#allocation9], 128  }
  0x25   :  { %183 = vsyncadd [#allocation9], 4294967168  ;;  %vm40_vm0 = vcmask 7168   ;;  %v188_v0 = vmov 0.0   ;;  %v44_v1 = vld [vmem:[#allocation5] sm:$0xff]  ;;  %vm48_vm1 = vcmask 261120  }
  0x26   :  { %42 = vst.msk [vmem:[#allocation3] sm:$0xff] %vm40_vm0, %v188_v0  ;;  %41 = vst.msk [vmem:[#allocation2] sm:$0xff] %vm40_vm0, %v188_v0  ;;  %v45_v2 = vld [vmem:[#allocation8] sm:$0xff]  ;;  %v56_v3 = vmul.f32 %v44_v1, %v44_v1  ;;  %s170_s6 = scalar_lea.hbm %s250_s2, 16 }
  0x27   :  { %43 = vst.msk [vmem:[#allocation4] sm:$0xff] %vm40_vm0, %v188_v0  ;;  %v63_v4 = vmul.f32 %v45_v2, %v45_v2  ;;  %v47_v5 = vmul.f32 %v45_v2, %v44_v1  ;;  %p171_p2 = scmp.ne.s32.totalorder %s250_s2, %s170_s6  ;;  %p174_p3 = scmp.lt.u32.totalorder %s170_s6, %s250_s2 }
  0x28   :  { %v57_v6 = vsel %vm48_vm1, %v56_v3, 0.0 }
  0x29   :  { %v49_v7 = vsel %vm48_vm1, %v47_v5, 0.0  ;;  %58 = vadd.xlane.f32.xlu0 %v57_v6  ;;  %v64_v8 = vsel %vm48_vm1, %v63_v4, 0.0  ;;  %p176_p4 = pnand %p174_p3, %p171_p2 }
  0x2a   :  { %50 = vadd.xlane.f32.xlu1 %v49_v7 }
  0x2d   :  { %65 = vadd.xlane.f32.xlu0 %v64_v8  ;;  %v55_v9 = vld [vmem:[#allocation3] sm:$0xff]  ;;  %v46_v10 = vld [vmem:[#allocation2] sm:$0xff] }
  0x2e   :  { %v62_v15 = vld [vmem:[#allocation4] sm:$0xff] }
  0xb6   :  { %v59_v11 = vpop.xlane.xlu0 %58 }
  0xb7   :  { %v51_v12 = vpop.xlane.xlu1 %50  ;;  %v60_v13 = vadd.f32 %v59_v11, %v55_v9 }
  0xb8   :  { %v52_v14 = vadd.f32 %v51_v12, %v46_v10 }
  0xb9   :  { %61 = vst.msk [vmem:[#allocation3] sm:$0xff] %vm40_vm0, %v60_v13 }
  0xba   :  { %54 = vst.msk [vmem:[#allocation2] sm:$0xff] %vm40_vm0, %v52_v14  ;;  %v66_v16 = vpop.xlane.xlu0 %65 }
  0xbb   :  { %v67_v17 = vadd.f32 %v66_v16, %v62_v15 }
  0xbd   :  { %68 = vst.msk [vmem:[#allocation4] sm:$0xff] %vm40_vm0, %v67_v17 }
  0xc0   :  { %v72_v18 = vld [vmem:[#allocation3] sm:$0xff] }
  0xc1   :  { %v73_v19 = vmax.f32 %v72_v18, 1e-16  ;;  %v79_v24 = vld [vmem:[#allocation2] sm:$0xff] }
  0xc3   :  { %122 = vrsqrt.f32 %v73_v19 }
  0xc4   :  { %v75_v20 = vld [vmem:[#allocation4] sm:$0xff] }
  0xc5   :  { %v76_v21 = vmax.f32 %v75_v20, 1e-16 }
  0xc7   :  { %124 = vrsqrt.f32 %v76_v21 }
  0xcd   :  { %v123_v22 = vpop.eup %122 }
  0xd1   :  { %v125_v23 = vpop.eup %124 }
  0xd2   :  { %v78_v25 = vmul.f32 %v125_v23, %v123_v22 }
  0xd4   :  { %v80_v26 = vmul.f32 %v79_v24, %v78_v25 }
  0xd6   :  { %v87_v27 = vsub.f32 1.0, %v80_v26 }
  0xd8   :  { %v89_v28 = vsel %vm40_vm0, %v87_v27, 0.0 }
  0xd9   :  { %90 = vadd.xlane.f32.xlu1 %v89_v28 }
 0x166   :  { %v91_v29 = vpop.xlane.xlu1 %90 }
 0x167   :  { %v92_v30 = vrot.slane %v91_v29, 4 }
 0x169   :  { %v93_v31 = vadd.f32 %v92_v30, %v91_v29 }
 0x16b   :  { %v94_v32 = vrot.slane %v93_v31, 2 }
 0x16d   :  { %v95_v33 = vadd.f32 %v94_v32, %v93_v31 }
 0x16f   :  { %v96_v34 = vrot.slane %v95_v33, 1 }
 0x171   :  { %v97_v35 = vadd.f32 %v96_v34, %v95_v33 }
 0x173   :  { %116 = vpush %v97_v35 }
 0x1a4   :  { %s117_s1 = spop %116 }
 0x1a5   :  { %100 = sst [smem:[#allocation10]] %s117_s1 }
 0x1a6   :  { %179 = shalt.err (!%p176_p4)
}
 0x1a7   :  { %s189_s11 = smov [#allocation10]  }
 0x1a8   :  { %108 = dma.smem_to_hbm %s189_s11, 16, %s250_s2, [#allocation7]  }
 0x1a9   :  { %184 = dma.done.wait [#allocation7], 16  }
 0x1aa   :  { %185 = vsyncadd [#allocation7], 4294967280 }
 0x1ab   :  { %112 = sfence }
 0x1ac   :  { %113 = vsyncpa [#allocation6], 1 }
 0x1ad   :  { %114 = vsyncpa [#allocation9], 1 }
 0x1ae   :  { %115 = vsyncpa [#allocation7], 1 }

</bundles_post_ra>
